<compile_context>
chip_gen: v7x
topology: tpu7x:2x2x1
jax: 0.10.0
libtpu: 0.0.40
codegen_flags: <defaults>
</compile_context>

<pallas_src>
import jax
import jax.numpy as jnp
from jax.experimental import pallas as pl
from jax.experimental.pallas import tpu as pltpu

IN_FEATURES = 28 * 28   # 784
H1 = 128
H2 = 64
H2_PAD = 128            # padded hidden-2 width (zero-padded -> exact math)
OUT_FEATURES = 10
OUT_PAD = 128           # lane-dense padded output width
MAX_TILE_B = 512        # batch rows per grid step


def mlp_kernel(x_ref, w1_ref, b1_ref, w2_ref, b2_ref, w3_ref, b3_ref, o_ref):
    # x_ref: (TB, 784) f32 (streamed); weights bf16; biases f32; output f32 (128 lanes).
    x = x_ref[...].astype(jnp.bfloat16)                               # cast in-kernel
    h1 = jnp.dot(x, w1_ref[...], preferred_element_type=jnp.float32) + b1_ref[...]
    h1 = jnp.maximum(h1, 0.0).astype(jnp.bfloat16)                    # (TB, 128)
    h2 = jnp.dot(h1, w2_ref[...], preferred_element_type=jnp.float32) + b2_ref[...]
    h2 = jnp.maximum(h2, 0.0).astype(jnp.bfloat16)                    # (TB, 128) padded
    out = jnp.dot(h2, w3_ref[...], preferred_element_type=jnp.float32) + b3_ref[...]
    o_ref[...] = out.astype(o_ref.dtype)                              # full-lane store


def prepare_params(params):
    """One-time prep: weights -> bf16, small dims zero-padded to MXU/lane-friendly
    shapes, biases kept f32."""
    w1, b1, w2, b2, w3, b3 = params
    w1p = w1.astype(jnp.bfloat16)                                      # (784, 128)
    w2p = (jnp.zeros((H1, H2_PAD), jnp.float32)
           .at[:, :H2].set(w2).astype(jnp.bfloat16))                   # (128, 128)
    w3p = (jnp.zeros((H2_PAD, OUT_PAD), jnp.float32)
           .at[:H2, :OUT_FEATURES].set(w3).astype(jnp.bfloat16))       # (128, 128)
    b1p = b1.reshape(1, H1).astype(jnp.float32)
    b2p = jnp.zeros((1, H2_PAD), jnp.float32).at[:, :H2].set(b2.reshape(1, H2))
    b3p = jnp.zeros((1, OUT_PAD), jnp.float32).at[:, :OUT_FEATURES].set(
        b3.reshape(1, OUT_FEATURES))
    return (w1p, b1p, w2p, b2p, w3p, b3p)


def ann_forward(x_nchw, kernel_params):
    """x_nchw: (B, 1, 28, 28) float32. Returns (B, 10) float32."""
    w1, b1, w2, b2, w3, b3 = kernel_params
    B = x_nchw.shape[0]
    x = x_nchw.reshape(B, -1)                       # nn.Flatten() — layout no-op
    assert x.shape[1] == IN_FEATURES

    # Batch tile: full batch if small (block == full dim, always legal); otherwise a
    # multiple-of-8 tile with the partial last block masked by Pallas.
    tile_b = B if B <= MAX_TILE_B else MAX_TILE_B
    grid = (pl.cdiv(B, tile_b),)

    flops = 2 * B * (IN_FEATURES * H1 + H1 * H2_PAD + H2_PAD * OUT_PAD)
    bytes_accessed = (x.size * 4
                      + (w1.size + w2.size + w3.size) * 2
                      + (b1.size + b2.size + b3.size) * 4
                      + B * OUT_PAD * 4)

    out = pl.pallas_call(
        mlp_kernel,
        out_shape=jax.ShapeDtypeStruct((B, OUT_PAD), jnp.float32),
        grid=grid,
        in_specs=[
            pl.BlockSpec((tile_b, IN_FEATURES), lambda i: (i, 0)),  # streamed input
            pl.BlockSpec((IN_FEATURES, H1), lambda i: (0, 0)),      # weights VMEM-resident
            pl.BlockSpec((1, H1), lambda i: (0, 0)),
            pl.BlockSpec((H1, H2_PAD), lambda i: (0, 0)),
            pl.BlockSpec((1, H2_PAD), lambda i: (0, 0)),
            pl.BlockSpec((H2_PAD, OUT_PAD), lambda i: (0, 0)),
            pl.BlockSpec((1, OUT_PAD), lambda i: (0, 0)),
        ],
        out_specs=pl.BlockSpec((tile_b, OUT_PAD), lambda i: (i, 0)),
        compiler_params=pltpu.CompilerParams(
            dimension_semantics=("parallel",),
        ),
        cost_estimate=pl.CostEstimate(
            flops=flops, transcendentals=0, bytes_accessed=bytes_accessed),
    )(x, w1, b1, w2, b2, w3, b3)

    return out[:B, :OUT_FEATURES]


def init_params(key):
    """Deterministic init mimicking PyTorch nn.Linear default (uniform +-1/sqrt(fan_in))."""
    dims = [(IN_FEATURES, H1), (H1, H2), (H2, OUT_FEATURES)]
    params = []
    for fan_in, fan_out in dims:
        kw, kb, key = jax.random.split(key, 3)
        bound = 1.0 / jnp.sqrt(float(fan_in))
        w = jax.random.uniform(kw, (fan_in, fan_out), jnp.float32, -bound, bound)
        b = jax.random.uniform(kb, (1, fan_out), jnp.float32, -bound, bound)
        params += [w, b]
    return tuple(params)


def ann_reference(x_nchw, params, compute_dtype=jnp.float32):
    """Pure-JAX reference. compute_dtype=bf16 emulates the kernel's matmul dtype."""
    w1, b1, w2, b2, w3, b3 = params
    x = x_nchw.reshape(x_nchw.shape[0], -1)

    def lin(a, w, b):
        return jnp.dot(a.astype(compute_dtype), w.astype(compute_dtype),
                       preferred_element_type=jnp.float32) + b

    h1 = jnp.maximum(lin(x, w1, b1), 0.0)
    h2 = jnp.maximum(lin(h1, w2, b2), 0.0)
    return lin(h2, w3, b3)


if __name__ == "__main__":
    key = jax.random.PRNGKey(0)
    kx, kp = jax.random.split(key)
    # Small MNIST-like batch: (B=2, C=1, H=28, W=28) -> flatten to 784 features.
    x = jax.random.normal(kx, (2, 1, 28, 28), jnp.float32)
    params = init_params(kp)
    kernel_params = prepare_params(params)

    out = jax.jit(ann_forward)(x, kernel_params)
    out = jax.block_until_ready(out)

    ref_bf16 = ann_reference(x, params, jnp.bfloat16)   # same matmul dtype as kernel
    ref_f32 = ann_reference(x, params, jnp.float32)     # full-precision sanity check

    assert out.shape == (2, 10)
    assert jnp.allclose(out, ref_bf16, atol=1e-3, rtol=1e-3)
    assert jnp.allclose(out, ref_f32, atol=5e-2, rtol=5e-2)
    print("KERNEL_OK")
</pallas_src>

<mosaic_0001>
module attributes {stable_mosaic.version = 11 : i64} {
  func.func @mlp_kernel(%arg0: i32, %arg1: memref<2x784xf32, #tpu.memory_space<vmem>>, %arg2: memref<784x128xbf16, #tpu.memory_space<vmem>>, %arg3: memref<1x128xf32, #tpu.memory_space<vmem>>, %arg4: memref<128x128xbf16, #tpu.memory_space<vmem>>, %arg5: memref<1x128xf32, #tpu.memory_space<vmem>>, %arg6: memref<128x128xbf16, #tpu.memory_space<vmem>>, %arg7: memref<1x128xf32, #tpu.memory_space<vmem>>, %arg8: memref<2x128xf32, #tpu.memory_space<vmem>>) attributes {dimension_semantics = [#tpu.dimension_semantics<parallel>], iteration_bounds = array<i64: 1>, scalar_prefetch = 0 : i64, scratch_operands = 0 : i64, tpu.core_type = #tpu.core_type<tc>, window_params = [{transform_indices = @transform_0, window_bounds = array<i64: 2, 784>}, {pipeline_mode = #tpu.pipeline_mode<synchronous>, transform_indices = @transform_1, window_bounds = array<i64: 784, 128>}, {pipeline_mode = #tpu.pipeline_mode<synchronous>, transform_indices = @transform_2, window_bounds = array<i64: 1, 128>}, {pipeline_mode = #tpu.pipeline_mode<synchronous>, transform_indices = @transform_3, window_bounds = array<i64: 128, 128>}, {pipeline_mode = #tpu.pipeline_mode<synchronous>, transform_indices = @transform_4, window_bounds = array<i64: 1, 128>}, {pipeline_mode = #tpu.pipeline_mode<synchronous>, transform_indices = @transform_5, window_bounds = array<i64: 128, 128>}, {pipeline_mode = #tpu.pipeline_mode<synchronous>, transform_indices = @transform_6, window_bounds = array<i64: 1, 128>}, {transform_indices = @transform_7, window_bounds = array<i64: 2, 128>}]} {
    %c0 = arith.constant 0 : index
    %c0_0 = arith.constant 0 : index
    %0 = vector.load %arg1[%c0, %c0_0] : memref<2x784xf32, #tpu.memory_space<vmem>>, vector<2x784xf32>
    %1 = arith.truncf %0 : vector<2x784xf32> to vector<2x784xbf16>
    %c0_1 = arith.constant 0 : index
    %c0_2 = arith.constant 0 : index
    %2 = vector.load %arg2[%c0_1, %c0_2] : memref<784x128xbf16, #tpu.memory_space<vmem>>, vector<784x128xbf16>
    %cst = arith.constant dense<0.000000e+00> : vector<2x128xf32>
    %3 = tpu.matmul %1, %2, %cst {dimension_numbers = #tpu.dot_dimension_numbers<[1], [0], [0], [1], [0, 0, 1, 1], [], []>} : vector<2x784xbf16>, vector<784x128xbf16>, vector<2x128xf32> -> vector<2x128xf32>
    %c0_3 = arith.constant 0 : index
    %c0_4 = arith.constant 0 : index
    %4 = vector.load %arg3[%c0_3, %c0_4] : memref<1x128xf32, #tpu.memory_space<vmem>>, vector<1x128xf32>
    %5 = vector.broadcast %4 : vector<1x128xf32> to vector<2x128xf32>
    %6 = arith.addf %3, %5 : vector<2x128xf32>
    %cst_5 = arith.constant 0.000000e+00 : f32
    %7 = vector.broadcast %cst_5 : f32 to vector<2x128xf32>
    %8 = arith.maximumf %6, %7 : vector<2x128xf32>
    %9 = arith.truncf %8 : vector<2x128xf32> to vector<2x128xbf16>
    %c0_6 = arith.constant 0 : index
    %c0_7 = arith.constant 0 : index
    %10 = vector.load %arg4[%c0_6, %c0_7] : memref<128x128xbf16, #tpu.memory_space<vmem>>, vector<128x128xbf16>
    %cst_8 = arith.constant dense<0.000000e+00> : vector<2x128xf32>
    %11 = tpu.matmul %9, %10, %cst_8 {dimension_numbers = #tpu.dot_dimension_numbers<[1], [0], [0], [1], [0, 0, 1, 1], [], []>} : vector<2x128xbf16>, vector<128x128xbf16>, vector<2x128xf32> -> vector<2x128xf32>
    %c0_9 = arith.constant 0 : index
    %c0_10 = arith.constant 0 : index
    %12 = vector.load %arg5[%c0_9, %c0_10] : memref<1x128xf32, #tpu.memory_space<vmem>>, vector<1x128xf32>
    %13 = vector.broadcast %12 : vector<1x128xf32> to vector<2x128xf32>
    %14 = arith.addf %11, %13 : vector<2x128xf32>
    %cst_11 = arith.constant 0.000000e+00 : f32
    %15 = vector.broadcast %cst_11 : f32 to vector<2x128xf32>
    %16 = arith.maximumf %14, %15 : vector<2x128xf32>
    %17 = arith.truncf %16 : vector<2x128xf32> to vector<2x128xbf16>
    %c0_12 = arith.constant 0 : index
    %c0_13 = arith.constant 0 : index
    %18 = vector.load %arg6[%c0_12, %c0_13] : memref<128x128xbf16, #tpu.memory_space<vmem>>, vector<128x128xbf16>
    %cst_14 = arith.constant dense<0.000000e+00> : vector<2x128xf32>
    %19 = tpu.matmul %17, %18, %cst_14 {dimension_numbers = #tpu.dot_dimension_numbers<[1], [0], [0], [1], [0, 0, 1, 1], [], []>} : vector<2x128xbf16>, vector<128x128xbf16>, vector<2x128xf32> -> vector<2x128xf32>
    %c0_15 = arith.constant 0 : index
    %c0_16 = arith.constant 0 : index
    %20 = vector.load %arg7[%c0_15, %c0_16] : memref<1x128xf32, #tpu.memory_space<vmem>>, vector<1x128xf32>
    %21 = vector.broadcast %20 : vector<1x128xf32> to vector<2x128xf32>
    %22 = arith.addf %19, %21 : vector<2x128xf32>
    %c0_17 = arith.constant 0 : index
    %c0_18 = arith.constant 0 : index
    %23 = vector.load %arg8[%c0_17, %c0_18] : memref<2x128xf32, #tpu.memory_space<vmem>>, vector<2x128xf32>
    tpu.vector_store %arg8[%c0_17, %c0_18], %22 {strides = array<i32>} : memref<2x128xf32, #tpu.memory_space<vmem>>, vector<2x128xf32>,
    return
  }
  func.func @transform_0(%arg0: i32) -> (i32, i32) {
    %c0_i32 = arith.constant 0 : i32
    %c0_i32_0 = arith.constant 0 : i32
    return %arg0, %c0_i32 : i32, i32
  }
  func.func @transform_1(%arg0: i32) -> (i32, i32) {
    %c0_i32 = arith.constant 0 : i32
    %c0_i32_0 = arith.constant 0 : i32
    %c0_i32_1 = arith.constant 0 : i32
    return %c0_i32, %c0_i32_0 : i32, i32
  }
  func.func @transform_2(%arg0: i32) -> (i32, i32) {
    %c0_i32 = arith.constant 0 : i32
    %c0_i32_0 = arith.constant 0 : i32
    %c0_i32_1 = arith.constant 0 : i32
    return %c0_i32, %c0_i32_0 : i32, i32
  }
  func.func @transform_3(%arg0: i32) -> (i32, i32) {
    %c0_i32 = arith.constant 0 : i32
    %c0_i32_0 = arith.constant 0 : i32
    %c0_i32_1 = arith.constant 0 : i32
    return %c0_i32, %c0_i32_0 : i32, i32
  }
  func.func @transform_4(%arg0: i32) -> (i32, i32) {
    %c0_i32 = arith.constant 0 : i32
    %c0_i32_0 = arith.constant 0 : i32
    %c0_i32_1 = arith.constant 0 : i32
    return %c0_i32, %c0_i32_0 : i32, i32
  }
  func.func @transform_5(%arg0: i32) -> (i32, i32) {
    %c0_i32 = arith.constant 0 : i32
    %c0_i32_0 = arith.constant 0 : i32
    %c0_i32_1 = arith.constant 0 : i32
    return %c0_i32, %c0_i32_0 : i32, i32
  }
  func.func @transform_6(%arg0: i32) -> (i32, i32) {
    %c0_i32 = arith.constant 0 : i32
    %c0_i32_0 = arith.constant 0 : i32
    %c0_i32_1 = arith.constant 0 : i32
    return %c0_i32, %c0_i32_0 : i32, i32
  }
  func.func @transform_7(%arg0: i32) -> (i32, i32) {
    %c0_i32 = arith.constant 0 : i32
    %c0_i32_0 = arith.constant 0 : i32
    return %arg0, %c0_i32 : i32, i32
  }
}

</mosaic_0001>

<bundles_post_ra>
// kernel: ann_forward.1
= control target key start
LH: loop header
LB: loop body
LE: loop exit
PB: predicated region body
PF: predicated region fallthrough
CT: control target
= control target key end

     0   :  { %12 = vsyncpa [#allocation3], 0  ;;  %s1379_s0 = inlined_call_operand.vmem [shape: f32[2,784], index: 0, kind: input, shape index: {}]   ;;  %s1380_s1 = inlined_call_operand.hbm [shape: bf16[784,128], index: 1, kind: input, shape index: {}]   ;;  %s1381_s2 = inlined_call_operand.vmem [shape: f32[1,128], index: 2, kind: input, shape index: {}]   ;;  %s1382_s3 = inlined_call_operand.vmem [shape: bf16[128,128], index: 3, kind: input, shape index: {}]   ;;  %s1383_s4 = inlined_call_operand.vmem [shape: f32[1,128], index: 4, kind: input, shape index: {}]   ;;  %s1384_s5 = inlined_call_operand.vmem [shape: bf16[128,128], index: 5, kind: input, shape index: {}]   ;;  %s1385_s6 = inlined_call_operand.vmem [shape: f32[1,128], index: 6, kind: input, shape index: {}]   ;;  %s1386_s7 = inlined_call_operand.hbm [shape: f32[2,128], index: 7, kind: output, shape index: {}]  }
   0x1   :  { %13 = vsyncpa [#allocation4], 0  ;;  %s1221_s24 = smov [#allocation2]   ;;  %s1173_s28 = scalar_lea.hbm %s1380_s1, 6272 }
   0x2   :  { %s21_s25 = sshll.u32 %s1221_s24, 4  ;;  %p1174_p0 = scmp.ne.s32.totalorder %s1380_s1, %s1173_s28  ;;  %s22_s25 = int_to_ptr.vmem [resolvable:$true] %s21_s25 }
   0x3   :  { %p1177_p1 = scmp.lt.u32.totalorder %s1173_s28, %s1380_s1 }
   0x5   :  { %p1179_p2 = pnand %p1177_p1, %p1174_p0 }
   0x7   :  { %1182 = shalt.err (!%p1179_p2)
}
   0x8   :  { %s1183_s10 = scalar_lea.vmem %s22_s25, 6272  ;;  %p1188_p4 = scmp.lt.s32.totalorder %s22_s25, %s22_s25 }
   0x9   :  { %p1184_p3 = scmp.ne.s32.totalorder %s22_s25, %s1183_s10  ;;  %p1189_p5 = scmp.lt.s32.totalorder %s1183_s10, %s1183_s10 }
   0xb   :  { %p1190_p6 = por %p1189_p5, %p1188_p4 }
   0xd   :  { %p1191_p7 = pnand %p1190_p6, %p1184_p3 }
   0xf   :  { %1194 = shalt.err (!%p1191_p7)
}
  0x10   :  { %s1222_s11 = smov 64   ;;  %s1223_s12 = smov 4  }
  0x11   :  { %27 = dma.hbm_to_vmem [thread:$0]  %s1380_s1, 6272, %s22_s25, [#allocation3], %s1222_s11, %s1222_s11, %s1223_s12  }
  0x12   :  { %1217 = dma.done.wait [#allocation3], 6272  }
  0x13   :  { %1218 = vsyncadd [#allocation3], 4294961024  ;;  %v1106_v0 = vld [vmem:[#allocation2 + $0x40] sm:$0xff]   ;;  %v1110_v4 = vld [vmem:[#allocation2 + $0x48] sm:$0xff]   ;;  %v1224_v21 = vmov 1983009808   ;;  %v50_v23 = vlaneseq }
  0x14   :  { %v1107_v1 = vld [vmem:[#allocation2] sm:$0xff]   ;;  %967 = vmatprep.subr.bf16.mxu0 %v1106_v0  ;;  %v1111_v5 = vld [vmem:[#allocation2 + $0x8] sm:$0xff]   ;;  %v1114_v8 = vld [vmem:[#allocation2 + $0x50] sm:$0xff]   ;;  %v48_v22 = vunpack.c.l.s4 %v1224_v21  ;;  %v1225_v45 = vmov 0.0   ;;  %vm1226_vm0 = vmmov 0   ;;  %vm492_vm1 = vcmask 130048  }
  0x15   :  { %v1108_v2 = vld [vmem:[#allocation2 + $0xc0] sm:$0xff]   ;;  %968 = vmatpush3.bf16.msra.mxu0 %v1107_v1  ;;  %v1112_v6 = vld [vmem:[#allocation2 + $0xc8] sm:$0xff]   ;;  %v1115_v9 = vld [vmem:[#allocation2 + $0x10] sm:$0xff]   ;;  %v51_v29 = vshrl.u32 %v50_v23, 7  ;;  %s1227_s28 = smov [#allocation5]  }
  0x16   :  { %v1109_v3 = vld [vmem:[#allocation2 + $0x80] sm:$0xff]   ;;  %989 = vmatprep.subr.bf16.mxu1 %v1108_v2  ;;  %969 = vmatprep.subr.bf16.mxu0 %v1110_v4  ;;  %v1113_v7 = vld [vmem:[#allocation2 + $0x88] sm:$0xff]   ;;  %v1116_v10 = vld [vmem:[#allocation2 + $0xd0] sm:$0xff]   ;;  %v49_v28 = vunpack.c.0.s8 %v48_v22  ;;  %s889_s29 = sshll.u32 %s1227_s28, 4  ;;  %s890_s29 = int_to_ptr.vmem [resolvable:$true] %s889_s29 }
  0x17   :  { %990 = vmatpush3.bf16.msra.mxu1 %v1109_v3  ;;  %v1117_v11 = vld [vmem:[#allocation2 + $0x90] sm:$0xff]   ;;  %v1118_v12 = vld [vmem:[#allocation2 + $0x58] sm:$0xff]   ;;  %v1122_v16 = vld [vmem:[#allocation2 + $0x60] sm:$0xff]   ;;  %p1200_p9 = scmp.lt.s32.totalorder %s890_s29, %s890_s29 }
  0x18   :  { %991 = vmatprep.subr.bf16.mxu1 %v1112_v6  ;;  %v1119_v13 = vld [vmem:[#allocation2 + $0x18] sm:$0xff]   ;;  %v1123_v17 = vld [vmem:[#allocation2 + $0x20] sm:$0xff]   ;;  %v1126_v20 = vld [vmem:[#allocation2 + $0x68] sm:$0xff]   ;;  %v52_v34 = vsub.s32 %v49_v28, %v51_v29 }
  0x19   :  { %970 = vmatpush3.bf16.msra.mxu0 %v1111_v5  ;;  %v1120_v14 = vld [vmem:[#allocation2 + $0xd8] sm:$0xff]   ;;  %v1124_v18 = vld [vmem:[#allocation2 + $0xe0] sm:$0xff]   ;;  %v1127_v24 = vld [vmem:[#allocation2 + $0x28] sm:$0xff]  }
  0x1a   :  { %971 = vmatprep.subr.bf16.mxu0 %v1114_v8  ;;  %v1121_v15 = vld [vmem:[#allocation2 + $0x98] sm:$0xff]   ;;  %v1125_v19 = vld [vmem:[#allocation2 + $0xa0] sm:$0xff]   ;;  %v1128_v25 = vld [vmem:[#allocation2 + $0xe8] sm:$0xff]  }
  0x1b   :  { %992 = vmatpush3.bf16.msra.mxu1 %v1113_v7  ;;  %v1129_v26 = vld [vmem:[#allocation2 + $0xa8] sm:$0xff]   ;;  %v1130_v27 = vld [vmem:[#allocation2 + $0x70] sm:$0xff]   ;;  %v1134_v33 = vld [vmem:[#allocation2 + $0x78] sm:$0xff]  }
  0x1c   :  { %993 = vmatprep.subr.bf16.mxu1 %v1116_v10  ;;  %v1131_v30 = vld [vmem:[#allocation2 + $0x30] sm:$0xff]   ;;  %v1135_v35 = vld [vmem:[#allocation2 + $0x38] sm:$0xff]   ;;  %v42_v37 = vld [vmem:[%s1379_s0] sm:$0xff] }
  0x1d   :  { %972 = vmatpush3.bf16.msra.mxu0 %v1115_v9  ;;  %v1132_v31 = vld [vmem:[#allocation2 + $0xf0] sm:$0xff]   ;;  %v1136_v36 = vld [vmem:[#allocation2 + $0xf8] sm:$0xff]   ;;  %v53_v38 = vrot.slane %v42_v37, %v52_v34  ;;  %v46_v40 = vcombine.high %v42_v37, %v42_v37  ;;  %v1138_v41 = vld [vmem:[#allocation2 + $0x140] sm:$0xff]  }
  0x1e   :  { %973 = vmatprep.subr.bf16.mxu0 %v1118_v12  ;;  %v1133_v32 = vld [vmem:[#allocation2 + $0xb0] sm:$0xff]   ;;  %v1137_v39 = vld [vmem:[#allocation2 + $0xb8] sm:$0xff]   ;;  %v1140_v48 = vld [vmem:[#allocation2 + $0x100] sm:$0xff]  }
  0x1f   :  { %994 = vmatpush3.bf16.msra.mxu1 %v1117_v11  ;;  %v61_v42 = vcombine.high %v53_v38, %v53_v38  ;;  %v60_v43 = vrot.slane %v46_v40, %v52_v34  ;;  %v86_v44 = vpack.c.bf16 %v53_v38, %v53_v38  ;;  %v1141_v50 = vld [vmem:[#allocation2 + $0x148] sm:$0xff]   ;;  %v1143_v53 = vld [vmem:[#allocation2 + $0x150] sm:$0xff]   ;;  %v1145_v55 = vld [vmem:[#allocation2 + $0x158] sm:$0xff]  }
  0x20   :  { %995 = vmatprep.subr.bf16.mxu1 %v1120_v14  ;;  %v1142_v52 = vld [vmem:[#allocation2 + $0x108] sm:$0xff]   ;;  %v1144_v54 = vld [vmem:[#allocation2 + $0x110] sm:$0xff]   ;;  %v1146_v56 = vld [vmem:[#allocation2 + $0x118] sm:$0xff]  }
  0x21   :  { %974 = vmatpush3.bf16.msra.mxu0 %v1119_v13  ;;  %v87_v46 = vpack.c.bf16 %v61_v42, %v61_v42  ;;  %v62_v47 = vcombine.high %v60_v43, %v60_v43  ;;  %v88_v49 = vpack.c.bf16 %v60_v43, %v60_v43  ;;  %v1147_v57 = vld [vmem:[#allocation2 + $0x160] sm:$0xff]   ;;  %v43_v59 = vld [vmem:[%s1379_s0 + $0x8] sm:$0x3f]  ;;  %v1151_v5 = vld [vmem:[#allocation2 + $0x170] sm:$0xff]  }
  0x22   :  { %975 = vmatprep.subr.bf16.mxu0 %v1122_v16  ;;  %v1155_v58 = vld [vmem:[#allocation2 + $0x180] sm:$0xff]   ;;  %v63_v61 = vcombine.high %v43_v59, %v43_v59  ;;  %v70_v62 = vrot.slane %v43_v59, %v52_v34  ;;  %v1149_v63 = vld [vmem:[#allocation2 + $0x168] sm:$0xff]   ;;  %v1152_v6 = vld [vmem:[#allocation2 + $0x130] sm:$0xff]  }
  0x23   :  { %996 = vmatpush3.bf16.msra.mxu1 %v1121_v15  ;;  %528 = vmatprep.mubr.bf16.mxu0 %v87_v46  ;;  %v89_v51 = vpack.c.bf16 %v62_v47, %v62_v47  ;;  %v1148_v60 = vld [vmem:[#allocation2 + $0x120] sm:$0xff]   ;;  %v1150_v2 = vld [vmem:[#allocation2 + $0x128] sm:$0xff]   ;;  %v1153_v7 = vld [vmem:[#allocation2 + $0x178] sm:$0xff]  }
  0x24   :  { %997 = vmatprep.subr.bf16.mxu1 %v1124_v18  ;;  %v77_v0 = vrot.slane %v63_v61, %v52_v34  ;;  %v78_v1 = vcombine.high %v70_v62, %v70_v62  ;;  %v1154_v8 = vld [vmem:[#allocation2 + $0x138] sm:$0xff]   ;;  %v90_v9 = vpack.c.bf16 %v70_v62, %v70_v62  ;;  %v1157_v10 = vld [vmem:[%s1382_s3] sm:$0xff]   ;;  %v1158_v11 = vld [vmem:[%s1382_s3 + $0x8] sm:$0xff]  }
  0x25   :  { %976 = vmatpush3.bf16.msra.mxu0 %v1123_v17  ;;  %568 = vmatprep.mubr.bf16.mxu1 %v89_v51  ;;  %v1159_v12 = vld [vmem:[%s1382_s3 + $0x10] sm:$0xff]   ;;  %v1160_v13 = vld [vmem:[%s1382_s3 + $0x18] sm:$0xff]   ;;  %v1161_v14 = vld [vmem:[%s1382_s3 + $0x20] sm:$0xff]  }
  0x26   :  { %977 = vmatprep.subr.bf16.mxu0 %v1126_v20  ;;  %v91_v3 = vpack.c.bf16 %v78_v1, %v78_v1  ;;  %v92_v4 = vpack.c.bf16 %v77_v0, %v77_v0  ;;  %v1162_v15 = vld [vmem:[%s1382_s3 + $0x28] sm:$0xff]   ;;  %v1163_v16 = vld [vmem:[%s1382_s3 + $0x30] sm:$0xff]   ;;  %v1164_v17 = vld [vmem:[%s1382_s3 + $0x38] sm:$0xff]  }
  0x27   :  { %998 = vmatpush3.bf16.msra.mxu1 %v1125_v19  ;;  %v1165_v18 = vld [vmem:[%s1384_s5] sm:$0xff]   ;;  %v1166_v19 = vld [vmem:[%s1384_s5 + $0x8] sm:$0xff]   ;;  %v1167_v20 = vld [vmem:[%s1384_s5 + $0x10] sm:$0xff]  }
  0x28   :  { %999 = vmatprep.subr.bf16.mxu1 %v1128_v25  ;;  %v1168_v21 = vld [vmem:[%s1384_s5 + $0x18] sm:$0xff]   ;;  %v1169_v22 = vld [vmem:[%s1384_s5 + $0x20] sm:$0xff]   ;;  %v1170_v23 = vld [vmem:[%s1384_s5 + $0x28] sm:$0xff]  }
  0x29   :  { %978 = vmatpush3.bf16.msra.mxu0 %v1127_v24  ;;  %v898_v25 = vld [vmem:[%s1381_s2] ss:$0 sm:$0xff]  ;;  %v1171_v51 = vld [vmem:[%s1384_s5 + $0x30] sm:$0xff]  }
  0x2a   :  { %979 = vmatprep.subr.bf16.mxu0 %v1130_v27 }
  0x2b   :  { %1000 = vmatpush3.bf16.msra.mxu1 %v1129_v26 }
  0x2c   :  { %1001 = vmatprep.subr.bf16.mxu1 %v1132_v31 }
  0x2d   :  { %980 = vmatpush3.bf16.msra.mxu0 %v1131_v30 }
  0x2e   :  { %981 = vmatprep.subr.bf16.mxu0 %v1134_v33 }
  0x2f   :  { %1002 = vmatpush3.bf16.msra.mxu1 %v1133_v32 }
  0x30   :  { %1003 = vmatprep.subr.bf16.mxu1 %v1136_v36 }
  0x31   :  { %982 = vmatpush3.bf16.msra.mxu0 %v1135_v35 }
  0x32   :  { %1011 = vmatprep.subr.bf16.mxu0 %v1138_v41 }
  0x33   :  { %1004 = vmatpush3.bf16.msra.mxu1 %v1137_v39 }
  0x34   :  { %1053 = vmatprep.subr.bf16.mxu1 %v1225_v45  ;;  %529 = vmatmul.mubr.bf16.vlgmr.msra.gmra.mrb[0].mxu0 %v86_v44 }
  0x35   :  { %1012 = vmatpush3.bf16.msra.mxu0 %v1140_v48  ;;  %608 = vmatprep.mubr.bf16.mxu0 %v91_v3 }
  0x36   :  { %569 = vmatmul.mubr.bf16.vlgmr.msra.gmra.mrb[0].mxu1 %v88_v49  ;;  %1013 = vmatprep.subr.bf16.mxu0 %v1141_v50 }
  0x37   :  { %1055 = vmatprep.mubr.msk.bf16.mxu1 %vm1226_vm0, %v1225_v45  ;;  %1054 = vmatpush3.bf16.msra.mxu1 %v1155_v58 }
  0x38   :  { %1059 = vmatprep.subr.bf16.mxu1 %v1225_v45 }
  0x39   :  { %1014 = vmatpush3.bf16.msra.mxu0 %v1142_v52  ;;  %v1172_v52 = vld [vmem:[%s1384_s5 + $0x38] sm:$0xff]  }
  0x3a   :  { %1015 = vmatprep.subr.bf16.mxu0 %v1143_v53  ;;  %v949_v53 = vld [vmem:[%s1383_s4] ss:$0 sm:$0xff]  ;;  %s1195_s4 = scalar_lea.vmem %s890_s29, 32 }
  0x3b   :  { %p1196_p8 = scmp.ne.s32.totalorder %s890_s29, %s1195_s4  ;;  %p1201_p10 = scmp.lt.s32.totalorder %s1195_s4, %s1195_s4 }
  0x3d   :  { %1016 = vmatpush3.bf16.msra.mxu0 %v1144_v54  ;;  %p1202_p11 = por %p1201_p10, %p1200_p9 }
  0x3e   :  { %1017 = vmatprep.subr.bf16.mxu0 %v1145_v55  ;;  %1056 = vmatmul.mubr.msk.bf16.vlgmr.msra.gmra.mrb[4].mxu1 %vm492_vm1, %v92_v4 }
  0x3f   :  { %1075 = vmatprep.mubr.msk.bf16.mxu1 %vm1226_vm0, %v1225_v45  ;;  %1060 = vmatpush3.bf16.msra.mxu1 %v1157_v10  ;;  %p1203_p12 = pnand %p1202_p11, %p1196_p8 }
  0x40   :  { %1061 = vmatprep.subr.bf16.mxu1 %v1225_v45 }
  0x41   :  { %1018 = vmatpush3.bf16.msra.mxu0 %v1146_v56 }
  0x42   :  { %1019 = vmatprep.subr.bf16.mxu0 %v1147_v57 }
  0x43   :  { %1062 = vmatpush3.bf16.msra.mxu1 %v1158_v11 }
  0x44   :  { %1063 = vmatprep.subr.bf16.mxu1 %v1225_v45 }
  0x45   :  { %1020 = vmatpush3.bf16.msra.mxu0 %v1148_v60 }
  0x46   :  { %1021 = vmatprep.subr.bf16.mxu0 %v1149_v63 }
  0x47   :  { %1064 = vmatpush3.bf16.msra.mxu1 %v1159_v12 }
  0x48   :  { %1065 = vmatprep.subr.bf16.mxu1 %v1225_v45 }
  0x49   :  { %1022 = vmatpush3.bf16.msra.mxu0 %v1150_v2 }
  0x4a   :  { %1023 = vmatprep.subr.bf16.mxu0 %v1151_v5 }
  0x4b   :  { %1066 = vmatpush3.bf16.msra.mxu1 %v1160_v13 }
  0x4c   :  { %1067 = vmatprep.subr.bf16.mxu1 %v1225_v45 }
  0x4d   :  { %1024 = vmatpush3.bf16.msra.mxu0 %v1152_v6 }
  0x4e   :  { %1025 = vmatprep.subr.bf16.mxu0 %v1153_v7 }
  0x4f   :  { %1068 = vmatpush3.bf16.msra.mxu1 %v1161_v14 }
  0x50   :  { %1069 = vmatprep.subr.bf16.mxu1 %v1225_v45 }
  0x51   :  { %1026 = vmatpush3.bf16.msra.mxu0 %v1154_v8 }
  0x52   :  { %1079 = vmatprep.subr.bf16.mxu0 %v1225_v45 }
  0x53   :  { %1070 = vmatpush3.bf16.msra.mxu1 %v1162_v15 }
  0x54   :  { %609 = vmatmul.mubr.bf16.vlgmr.msra.gmra.mrb[4].mxu0 %v90_v9  ;;  %1071 = vmatprep.subr.bf16.mxu1 %v1225_v45 }
  0x55   :  { %1095 = vmatprep.mubr.msk.bf16.mxu0 %vm1226_vm0, %v1225_v45  ;;  %1080 = vmatpush3.bf16.msra.mxu0 %v1165_v18 }
  0x56   :  { %1081 = vmatprep.subr.bf16.mxu0 %v1225_v45 }
  0x57   :  { %1072 = vmatpush3.bf16.msra.mxu1 %v1163_v16 }
  0x58   :  { %1073 = vmatprep.subr.bf16.mxu1 %v1225_v45 }
  0x59   :  { %1082 = vmatpush3.bf16.msra.mxu0 %v1166_v19 }
  0x5a   :  { %1083 = vmatprep.subr.bf16.mxu0 %v1225_v45 }
  0x5b   :  { %1074 = vmatpush3.bf16.msra.mxu1 %v1164_v17 }
  0x5d   :  { %1084 = vmatpush3.bf16.msra.mxu0 %v1167_v20 }
  0x5e   :  { %1085 = vmatprep.subr.bf16.mxu0 %v1225_v45 }
  0x61   :  { %1086 = vmatpush3.bf16.msra.mxu0 %v1168_v21 }
  0x62   :  { %1087 = vmatprep.subr.bf16.mxu0 %v1225_v45 }
  0x65   :  { %1088 = vmatpush3.bf16.msra.mxu0 %v1169_v22 }
  0x66   :  { %1089 = vmatprep.subr.bf16.mxu0 %v1225_v45 }
  0x69   :  { %1090 = vmatpush3.bf16.msra.mxu0 %v1170_v23 }
  0x6a   :  { %1091 = vmatprep.subr.bf16.mxu0 %v1225_v45 }
  0x6d   :  { %1092 = vmatpush3.bf16.msra.mxu0 %v1171_v51 }
  0x6e   :  { %1093 = vmatprep.subr.bf16.mxu0 %v1225_v45  ;;  %v958_v45 = vld [vmem:[%s1385_s6] ss:$0 sm:$0xff] }
  0x71   :  { %1094 = vmatpush3.bf16.msra.mxu0 %v1172_v52 }
 0x107   :  { %v983_v24 = vpop.f32.mrb[0].mxu0 }
 0x108   :  { %v984_v26 = vpop.f32.mrb[1].mxu0 }
 0x109   :  { %v985_v27 = vadd.f32 %v984_v26, %v983_v24  ;;  %v986_v28 = vpop.f32.mrb[2].mxu0  ;;  %v1005_v29 = vpop.f32.mrb[0].mxu1 }
 0x10a   :  { %v987_v30 = vpop.f32.mrb[3].mxu0  ;;  %v1006_v31 = vpop.f32.mrb[1].mxu1 }
 0x10b   :  { %v531_v32 = vadd.f32 %v985_v27, %v898_v25  ;;  %v1007_v33 = vadd.f32 %v1006_v31, %v1005_v29  ;;  %v1008_v34 = vpop.f32.mrb[2].mxu1 }
 0x10c   :  { %v1009_v35 = vpop.f32.mrb[3].mxu1 }
 0x10d   :  { %v571_v36 = vadd.f32 %v1007_v33, %v531_v32 }
 0x111   :  { %v650_v37 = vpop.f32.mrb[4].mxu1 }
 0x112   :  { %v1057_v38 = vpop.f32.mrb[5].mxu1 }
 0x113   :  { %v653_v39 = vpop.f32.mrb[6].mxu1 }
 0x114   :  { %v1058_v40 = vpop.f32.mrb[7].mxu1 }
 0x127   :  { %v1027_v41 = vpop.f32.mrb[4].mxu0 }
 0x128   :  { %v1028_v42 = vpop.f32.mrb[5].mxu0 }
 0x129   :  { %v1029_v43 = vadd.f32 %v1028_v42, %v1027_v41  ;;  %v1030_v44 = vpop.f32.mrb[6].mxu0 }
 0x12a   :  { %v1031_v46 = vpop.f32.mrb[7].mxu0 }
 0x12b   :  { %v611_v47 = vadd.f32 %v1029_v43, %v571_v36 }
 0x12d   :  { %v651_v48 = vadd.f32 %v650_v37, %v611_v47 }
 0x12f   :  { %v656_v49 = vmax.f32 %v651_v48, 0.0 }
 0x131   :  { %v657_v50 = vpack.c.bf16 %v656_v49, %v656_v49 }
 0x133   :  { %1076 = vmatmul.mubr.bf16.vlgmr.msra.gmra.mrb[8].mxu1 %v657_v50 }
 0x206   :  { %v763_v54 = vpop.f32.mrb[8].mxu1 }
 0x207   :  { %v764_v55 = vadd.f32 %v949_v53, %v763_v54  ;;  %v1077_v56 = vpop.f32.mrb[9].mxu1 }
 0x208   :  { %v766_v57 = vpop.f32.mrb[10].mxu1 }
 0x209   :  { %v769_v58 = vmax.f32 %v764_v55, 0.0  ;;  %v1078_v59 = vpop.f32.mrb[11].mxu1 }
 0x20b   :  { %v770_v60 = vpack.c.bf16 %v769_v58, %v769_v58 }
 0x20d   :  { %1096 = vmatmul.mubr.bf16.vlgmr.msra.gmra.mrb[8].mxu0 %v770_v60 }
 0x2e0   :  { %v876_v61 = vpop.f32.mrb[8].mxu0 }
 0x2e1   :  { %v877_v62 = vadd.f32 %v958_v45, %v876_v61  ;;  %v1097_v63 = vpop.f32.mrb[9].mxu0 }
 0x2e2   :  { %v879_v0 = vpop.f32.mrb[10].mxu0 }
 0x2e3   :  { %882 = vst [vmem:[#allocation5] sm:$0x3] %v877_v62  ;;  %v1098_v1 = vpop.f32.mrb[11].mxu0 }
 0x2e4   :  { %1206 = shalt.err (!%p1203_p12)
}
 0x2e5   :  { %s1207_s6 = scalar_lea.hbm %s1386_s7, 32 }
 0x2e6   :  { %p1208_p13 = scmp.ne.s32.totalorder %s1386_s7, %s1207_s6  ;;  %p1211_p0 = scmp.lt.u32.totalorder %s1207_s6, %s1386_s7 }
 0x2e8   :  { %p1213_p1 = pnand %p1211_p0, %p1208_p13 }
 0x2ea   :  { %1216 = shalt.err (!%p1213_p1)
}
 0x2eb   :  { %892 = dma.vmem_to_hbm [thread:$0]  %s890_s29, 32, %s1386_s7, [#allocation4]  }
 0x2ec   :  { %1219 = dma.done.wait [#allocation4], 32  }
 0x2ed   :  { %1220 = vsyncadd [#allocation4], 4294967264 }
 0x2ee   :  { %896 = vsyncpa [#allocation3], 1 }
 0x2ef   :  { %897 = vsyncpa [#allocation4], 1 }

</bundles_post_ra>
